<compile_context>
chip_gen: v6e
topology: v6e:2x2x1
jax: 0.10.0
libtpu: 0.0.40
codegen_flags: <defaults>
</compile_context>

<pallas_src>
import functools

import jax
import jax.numpy as jnp
from jax.experimental import pallas as pl
from jax.experimental.pallas import tpu as pltpu


# ----------------------------- kernels ------------------------------------- #

def encode_kernel(x_ref, we_ref, wbt_ref, enc_ref, bw_ref, *, a, c):
    """enc = x @ We^T accumulated over N tiles; bandwidth head on the final tile."""
    j = pl.program_id(0)

    @pl.when(j == 0)
    def _init():
        enc_ref[...] = jnp.zeros_like(enc_ref)

    # x tile: (B, TN), We tile: (n, TN)  -> partial contraction over this N tile.
    enc_ref[...] += jnp.dot(x_ref[...], we_ref[...].T,
                            preferred_element_type=jnp.float32)

    @pl.when(j == pl.num_programs(0) - 1)
    def _finalize():
        raw = jnp.dot(enc_ref[...], wbt_ref[...],
                      preferred_element_type=jnp.float32)          # (B, n*m)
        bw_ref[...] = a * jax.nn.sigmoid(raw) + c                  # affine-scaled bandwidths


def decode_kernel(enc_ref, bw_ref, onehot_ref, dist_ref, basis_ref, out_ref, *, mu):
    B, n = enc_ref.shape
    K = dist_ref.shape[0]
    m = onehot_ref.shape[0]
    tn = out_ref.shape[1]

    enc = enc_ref[...]                       # (B, n)     grid-invariant (constant index map)
    bw2 = bw_ref[...]                        # (B*n, m)   grid-invariant, tiny
    onehot = onehot_ref[...]                 # (m, TN)

    # Label gather bandwidths[:, :, labels]: exact one-hot select over m (unrolled, m is tiny).
    # (The review suggested an MXU matmul here; at m=4 it is a wash and the exact VPU select
    #  keeps the gather bit-identical to the reference gather semantics.)
    bw_pt = jnp.zeros((B * n, tn), jnp.float32)
    for mm in range(m):
        bw_pt = bw_pt + bw2[:, mm][:, None] * onehot[mm][None, :]

    scaled = bw_pt * mu
    inv_sq = (1.0 / (scaled * scaled)).reshape(B, n, tn)           # (B, n, TN)

    d2_all = dist_ref[...] * dist_ref[...]                         # (K, TN)

    # K as a leading loop axis: accumulate UNnormalised smoothed basis + denominator.
    smoothed = jnp.zeros((B, n, tn), jnp.float32)
    denom = jnp.zeros((B, n, tn), jnp.float32)
    for k in range(K):                                             # K is small and static
        w = jnp.maximum(1.0 - d2_all[k][None, None, :] * inv_sq, 0.0)   # (B, n, TN)
        basis_k = basis_ref[k].astype(jnp.float32)                 # (n, TN), upcast after load
        smoothed = smoothed + w * basis_k[None, :, :]
        denom = denom + w

    # Fused normalisation + code contraction:
    #   out[b, j] = sum_i enc[b, i] * smoothed[b, i, j] / denom[b, i, j]
    # Exact divide kept: after fusion there are only (B, n, TN) of them (K x fewer than before);
    # pl.reciprocal(approx=True) would risk exceeding the 1e-4 comparison below.
    recon = smoothed * (1.0 / denom)
    out_ref[...] = jnp.sum(enc[:, :, None] * recon, axis=1)        # (B, TN)


# ----------------------------- wrapper -------------------------------------- #

def nrbs_forward(x, We, Wd, Wb, neighbour_id, neighbour_distance,
                 clustering_labels, mu, m, tn=512):
    B, N = x.shape
    n = We.shape[0]
    K = neighbour_id.shape[1]
    tn = min(tn, N)
    assert N % tn == 0, "N must be a multiple of the tile size"

    a = 1.0 / 60.0 - 4.0 / 60.0 / mu
    c = 4.0 / 60.0 / mu

    # --- stage 1: encode + bandwidth head, tiled over N with an on-chip accumulator ---
    enc, bw = pl.pallas_call(
        functools.partial(encode_kernel, a=a, c=c),
        out_shape=(jax.ShapeDtypeStruct((B, n), jnp.float32),
                   jax.ShapeDtypeStruct((B, n * m), jnp.float32)),
        grid=(N // tn,),
        in_specs=[
            pl.BlockSpec((B, tn), lambda j: (0, j)),         # x tile
            pl.BlockSpec((n, tn), lambda j: (0, j)),         # We tile, N on lanes
            pl.BlockSpec((n, n * m), lambda j: (0, 0)),      # Wb^T (tiny, resident)
        ],
        out_specs=(
            pl.BlockSpec((B, n), lambda j: (0, 0)),          # enc accumulator
            pl.BlockSpec((B, n * m), lambda j: (0, 0)),      # bandwidths (written at last step)
        ),
        compiler_params=pltpu.CompilerParams(
            dimension_semantics=("arbitrary",)),             # reduction over N tiles
    )(x, We, Wb.T)
    bw2d = bw.reshape(B * n, m)

    # --- glue: one-time parameter-side prep (plain JAX) ---
    # basis[k, i, j] = Wd[i, neighbour_id[j, k]], gathered directly into the (K, n, N)
    # kernel layout (leading-axis permute only -- no minor-dim transpose of the big array).
    basis_knt = jnp.transpose(Wd[:, neighbour_id.T], (1, 0, 2)).astype(jnp.float32)   # (K, n, N)
    # TODO(synk): streaming basis_knt as bfloat16 would halve decode HBM traffic, but the
    # quantisation exceeds the 1e-4 check used below, so it stays float32 (the kernel already
    # upcasts after load so bf16 is a one-line switch when tolerance permits).
    # TODO(synk): an in-kernel gather of Wd columns (data-dependent lane gather) would remove
    # the K-fold basis blow-up entirely, but arbitrary lane gathers are not cleanly expressible.
    dist_kt = neighbour_distance.T.astype(jnp.float32)                                 # (K, N)
    onehot = jax.nn.one_hot(clustering_labels, m, dtype=jnp.float32).T                 # (m, N)

    # --- stage 2: bubble smoothing + reconstruction, tiled over N ---
    out = pl.pallas_call(
        functools.partial(decode_kernel, mu=mu),
        out_shape=jax.ShapeDtypeStruct((B, N), jnp.float32),
        grid=(N // tn,),
        in_specs=[
            pl.BlockSpec((B, n), lambda j: (0, 0)),          # enc   (grid-invariant, resident)
            pl.BlockSpec((B * n, m), lambda j: (0, 0)),      # bw    (grid-invariant, resident)
            pl.BlockSpec((m, tn), lambda j: (0, j)),         # one-hot clustering labels
            pl.BlockSpec((K, tn), lambda j: (0, j)),         # neighbour distances
            pl.BlockSpec((K, n, tn), lambda j: (0, 0, j)),   # gathered decoder rows
        ],
        out_specs=pl.BlockSpec((B, tn), lambda j: (0, j)),   # lane-dense output tile
        compiler_params=pltpu.CompilerParams(
            dimension_semantics=("parallel",),               # N tiles independent (megacore / v7x)
            vmem_limit_bytes=32 * 1024 * 1024),              # fits v5e..v7x scoped VMEM budgets
    )(enc, bw2d, onehot, dist_kt, basis_knt)
    return out


# ----------------------------- pure-JAX reference --------------------------- #

def nrbs_reference(x, We, Wd, Wb, neighbour_id, neighbour_distance,
                   clustering_labels, mu, m):
    enc = x @ We.T                                                         # (B, n)
    bw = jax.nn.sigmoid(enc @ Wb.T)
    bw = (1.0 / 60.0 - 4.0 / 60.0 / mu) * bw + 4.0 / 60.0 / mu
    bw = bw.reshape(x.shape[0], -1, m)
    bw_pt = bw[:, :, clustering_labels]                                    # (B, n, N)
    basis = Wd[:, neighbour_id]                                            # (n, N, K)
    d2 = neighbour_distance ** 2                                           # (N, K)
    window = jnp.maximum(1.0 - d2[None, None] / (bw_pt[..., None] * mu) ** 2, 0.0)
    window = window / jnp.sum(window, axis=-1, keepdims=True)
    smoothed = jnp.sum(basis[None] * window, axis=-1)                      # (B, n, N)
    return jnp.einsum('bi,bin->bn', enc, smoothed)


# ----------------------------- main ----------------------------------------- #

if __name__ == "__main__":
    B, N, n, m, K = 2, 1024, 8, 4, 8
    mu = 2.0

    key = jax.random.PRNGKey(0)
    kx, ke, kd, kb, kid, kdist, klab = jax.random.split(key, 7)

    # deterministic parameter init (torch.nn.Linear-style uniform ranges)
    We = jax.random.uniform(ke, (n, N), jnp.float32, -1.0 / N**0.5, 1.0 / N**0.5)
    Wd = jax.random.uniform(kd, (n, N), jnp.float32, -1.0 / N**0.5, 1.0 / N**0.5)
    Wb = jax.random.uniform(kb, (n * m, n), jnp.float32, -1.0 / n**0.5, 1.0 / n**0.5)

    # synthetic neighbourhood structure
    neighbour_id = jax.random.randint(kid, (N, K), 0, N)
    neighbour_id = neighbour_id.at[:, 0].set(jnp.arange(N))                # self is first neighbour
    neighbour_distance = jax.random.uniform(kdist, (N, K), jnp.float32, 0.0, 0.05)
    neighbour_distance = neighbour_distance.at[:, 0].set(0.0)              # self distance = 0
    clustering_labels = jax.random.randint(klab, (N,), 0, m)
    # TODO(synk): group_indices from the torch module is only a partition of range(N); the
    # vectorized kernel covers all points at once, so it is not materialized here.

    x = jax.random.normal(kx, (B, N), jnp.float32)

    out = nrbs_forward(x, We, Wd, Wb, neighbour_id, neighbour_distance,
                       clustering_labels, mu, m)
    out = jax.block_until_ready(out)

    ref = nrbs_reference(x, We, Wd, Wb, neighbour_id, neighbour_distance,
                         clustering_labels, mu, m)
    assert out.shape == (B, N)
    err = jnp.max(jnp.abs(out - ref))
    assert jnp.allclose(out, ref, rtol=1e-4, atol=1e-4), f"max abs err {err}"

    print("KERNEL_OK")
</pallas_src>

<mosaic_0001>
module attributes {stable_mosaic.version = 11 : i64} {
  func.func @encode_kernel(%arg0: i32, %arg1: memref<2x512xf32, #tpu.memory_space<vmem>>, %arg2: memref<8x512xf32, #tpu.memory_space<vmem>>, %arg3: memref<8x32xf32, #tpu.memory_space<vmem>>, %arg4: memref<2x8xf32, #tpu.memory_space<vmem>>, %arg5: memref<2x32xf32, #tpu.memory_space<vmem>>) attributes {dimension_semantics = [#tpu.dimension_semantics<arbitrary>], iteration_bounds = array<i64: 2>, scalar_prefetch = 0 : i64, scratch_operands = 0 : i64, tpu.core_type = #tpu.core_type<tc>, window_params = [{transform_indices = @transform_0, window_bounds = array<i64: 2, 512>}, {transform_indices = @transform_1, window_bounds = array<i64: 8, 512>}, {pipeline_mode = #tpu.pipeline_mode<synchronous>, transform_indices = @transform_2, window_bounds = array<i64: 8, 32>}, {pipeline_mode = #tpu.pipeline_mode<synchronous>, transform_indices = @transform_3, window_bounds = array<i64: 2, 8>}, {pipeline_mode = #tpu.pipeline_mode<synchronous>, transform_indices = @transform_4, window_bounds = array<i64: 2, 32>}]} {
    %c0_i32 = arith.constant 0 : i32
    %0 = arith.cmpi eq, %arg0, %c0_i32 : i32
    %1 = arith.extui %0 : i1 to i32
    %c0_i32_0 = arith.constant 0 : i32
    %2 = arith.cmpi ne, %1, %c0_i32_0 : i32
    scf.if %2 {
      %cst_9 = arith.constant 0.000000e+00 : f32
      %13 = vector.broadcast %cst_9 : f32 to vector<2x8xf32>
      %c0_10 = arith.constant 0 : index
      %c0_11 = arith.constant 0 : index
      %14 = vector.load %arg4[%c0_10, %c0_11] : memref<2x8xf32, #tpu.memory_space<vmem>>, vector<2x8xf32>
      tpu.vector_store %arg4[%c0_10, %c0_11], %13 {strides = array<i32>} : memref<2x8xf32, #tpu.memory_space<vmem>>, vector<2x8xf32>,
    } else {
    }
    %c0 = arith.constant 0 : index
    %c0_1 = arith.constant 0 : index
    %3 = vector.load %arg4[%c0, %c0_1] : memref<2x8xf32, #tpu.memory_space<vmem>>, vector<2x8xf32>
    %c0_2 = arith.constant 0 : index
    %c0_3 = arith.constant 0 : index
    %4 = vector.load %arg1[%c0_2, %c0_3] : memref<2x512xf32, #tpu.memory_space<vmem>>, vector<2x512xf32>
    %c0_4 = arith.constant 0 : index
    %c0_5 = arith.constant 0 : index
    %5 = vector.load %arg2[%c0_4, %c0_5] : memref<8x512xf32, #tpu.memory_space<vmem>>, vector<8x512xf32>
    %6 = tpu.transpose %5, [1, 0] : vector<8x512xf32> -> vector<512x8xf32>
    %cst = arith.constant dense<0.000000e+00> : vector<2x8xf32>
    %7 = tpu.matmul %4, %6, %cst {dimension_numbers = #tpu.dot_dimension_numbers<[1], [0], [0], [1], [0, 0, 1, 1], [], []>} : vector<2x512xf32>, vector<512x8xf32>, vector<2x8xf32> -> vector<2x8xf32>
    %8 = arith.addf %3, %7 : vector<2x8xf32>
    %c0_6 = arith.constant 0 : index
    %c0_7 = arith.constant 0 : index
    %9 = vector.load %arg4[%c0_6, %c0_7] : memref<2x8xf32, #tpu.memory_space<vmem>>, vector<2x8xf32>
    tpu.vector_store %arg4[%c0_6, %c0_7], %8 {strides = array<i32>} : memref<2x8xf32, #tpu.memory_space<vmem>>, vector<2x8xf32>,
    %c1_i32 = arith.constant 1 : i32
    %10 = arith.cmpi eq, %arg0, %c1_i32 : i32
    %11 = arith.extui %10 : i1 to i32
    %c0_i32_8 = arith.constant 0 : i32
    %12 = arith.cmpi ne, %11, %c0_i32_8 : i32
    scf.if %12 {
      %c0_9 = arith.constant 0 : index
      %c0_10 = arith.constant 0 : index
      %13 = vector.load %arg4[%c0_9, %c0_10] : memref<2x8xf32, #tpu.memory_space<vmem>>, vector<2x8xf32>
      %c0_11 = arith.constant 0 : index
      %c0_12 = arith.constant 0 : index
      %14 = vector.load %arg3[%c0_11, %c0_12] : memref<8x32xf32, #tpu.memory_space<vmem>>, vector<8x32xf32>
      %cst_13 = arith.constant dense<0.000000e+00> : vector<2x32xf32>
      %15 = tpu.matmul %13, %14, %cst_13 {dimension_numbers = #tpu.dot_dimension_numbers<[1], [0], [0], [1], [0, 0, 1, 1], [], []>} : vector<2x8xf32>, vector<8x32xf32>, vector<2x32xf32> -> vector<2x32xf32>
      %16 = arith.negf %15 : vector<2x32xf32>
      %17 = math.exp %16 : vector<2x32xf32>
      %cst_14 = arith.constant 1.000000e+00 : f32
      %18 = vector.broadcast %cst_14 : f32 to vector<2x32xf32>
      %19 = arith.addf %18, %17 : vector<2x32xf32>
      %20 = arith.divf %18, %19 : vector<2x32xf32>
      %cst_15 = arith.constant -0.0166666675 : f32
      %21 = vector.broadcast %cst_15 : f32 to vector<2x32xf32>
      %22 = arith.mulf %21, %20 : vector<2x32xf32>
      %cst_16 = arith.constant 0.0333333351 : f32
      %23 = vector.broadcast %cst_16 : f32 to vector<2x32xf32>
      %24 = arith.addf %22, %23 : vector<2x32xf32>
      %c0_17 = arith.constant 0 : index
      %c0_18 = arith.constant 0 : index
      %25 = vector.load %arg5[%c0_17, %c0_18] : memref<2x32xf32, #tpu.memory_space<vmem>>, vector<2x32xf32>
      tpu.vector_store %arg5[%c0_17, %c0_18], %24 {strides = array<i32>} : memref<2x32xf32, #tpu.memory_space<vmem>>, vector<2x32xf32>,
    } else {
    }
    return
  }
  func.func @transform_0(%arg0: i32) -> (i32, i32) {
    %c0_i32 = arith.constant 0 : i32
    %c0_i32_0 = arith.constant 0 : i32
    return %c0_i32, %arg0 : i32, i32
  }
  func.func @transform_1(%arg0: i32) -> (i32, i32) {
    %c0_i32 = arith.constant 0 : i32
    %c0_i32_0 = arith.constant 0 : i32
    return %c0_i32, %arg0 : i32, i32
  }
  func.func @transform_2(%arg0: i32) -> (i32, i32) {
    %c0_i32 = arith.constant 0 : i32
    %c0_i32_0 = arith.constant 0 : i32
    %c0_i32_1 = arith.constant 0 : i32
    return %c0_i32, %c0_i32_0 : i32, i32
  }
  func.func @transform_3(%arg0: i32) -> (i32, i32) {
    %c0_i32 = arith.constant 0 : i32
    %c0_i32_0 = arith.constant 0 : i32
    %c0_i32_1 = arith.constant 0 : i32
    return %c0_i32, %c0_i32_0 : i32, i32
  }
  func.func @transform_4(%arg0: i32) -> (i32, i32) {
    %c0_i32 = arith.constant 0 : i32
    %c0_i32_0 = arith.constant 0 : i32
    %c0_i32_1 = arith.constant 0 : i32
    return %c0_i32, %c0_i32_0 : i32, i32
  }
}

</mosaic_0001>

<bundles_post_ra>
// kernel: tpu_custom_call.1
= control target key start
LH: loop header
LB: loop body
LE: loop exit
PB: predicated region body
PF: predicated region fallthrough
CT: control target
= control target key end

     0   :  { %10 = vsyncpa [#allocation3], 0  ;;  %s1151_s0 = inlined_call_operand.hbm [shape: f32[2,1024], index: 0, kind: input, shape index: {}]   ;;  %s1152_s1 = inlined_call_operand.hbm [shape: f32[8,1024], index: 1, kind: input, shape index: {}]   ;;  %s1153_s2 = inlined_call_operand.hbm [shape: f32[8,32], index: 2, kind: input, shape index: {}]   ;;  %s1154_s3 = inlined_call_operand.hbm [shape: f32[2,8], index: 3, kind: output, shape index: {0}]   ;;  %s1155_s4 = inlined_call_operand.hbm [shape: f32[2,32], index: 4, kind: output, shape index: {1}]  }
   0x1   :  { %12 = vsyncpa [#allocation3 + $0x1], 0 }
   0x2   :  { %13 = vsyncpa [#allocation6], 0 }
   0x3   :  { %15 = vsyncpa [#allocation6 + $0x1], 0 }
   0x4   :  { %16 = vsyncpa [#allocation4], 0 }
   0x5   :  { %17 = vsyncpa [#allocation10], 0  ;;  %s958_s15 = smov 0   ;;  %s960_s16 = smov 0  }
   0x6   :  { %s962_s17 = smov 0   ;;  %s964_s18 = smov 0  }
   0x7 LB: > { %s977_s19 = sadd.s32 4294967295, %s922_s18   ;;  %s980_s20 = sadd.s32 1, %s922_s18   ;;  %s922_s18 = sphi %s964_s18, %s1172_s18   ;;  %s918_s17 = sphi %s962_s17, %s1171_s17   ;;  %s914_s16 = sphi %s960_s16, %s1170_s16   ;;  %s910_s15 = sphi %s958_s15, %s1169_s15  }
   0x8   : > { %s27_s21 = ssub.s32 %s922_s18, %s980_s20  ;;  %s30_s22 = sadd.s32 1, %s918_s17 }
   0x9   : > { %p28_p0 = scmp.eq.s32.totalorder %s27_s21, 0  ;;  %p37_p1 = scmp.ne.s32.totalorder %s918_s17, %s914_s16 }
   0xa   : > { %p43_p2 = scmp.ne.s32.totalorder %s914_s16, %s910_s15  ;;  %p1158_p3 = scmp.eq.s32.totalorder %s977_s19, 0 }
   0xb   : > { %s990_s23 = scalar_select %p28_p0, %s918_s17, %s30_s22  }
   0xc   : > { %p994_p4 = por %p1158_p3, %p43_p2  ;;  %p632_p5 = scmp.ge.s32.totalorder %s922_s18, 1 }
   0xd   : > { %p143_p6 = scmp.lt.s32.totalorder %s922_s18, 3  ;;  %s924_s26 = smov [#allocation7]  }
   0xe   : > { %s1159_s24 = scalar_select %p994_p4, 1, 0 }
   0xf   : > { %p1001_p8 = pnand %p632_p5, %p143_p6  ;;  %s156_s27 = sshll.u32 %s924_s26, 4  ;;  %s157_s27 = int_to_ptr.vmem [resolvable:$true] %s156_s27 }
  0x10   : > { %p38_p9 = scmp.eq.s32.totalorder %s922_s18, 0  ;;  %s1017_s29 = sand.u32 1, %s918_s17  }
  0x11   : > { %s1160_s25 = scalar_select %p1001_p8, 1, 0 }
  0x12   : > { %p680_p10 = pneg %p1001_p8  ;;  %p1012_p12 = por %p38_p9, %p37_p1 }
  0x13   : > { %s635_s30 = sshll.u32 %s1017_s29, 3  ;;  %s655_s5 = sshll.u32 %s922_s18, 7 }
  0x14   : > { %p681_p13 = pnand %p680_p10, %p1158_p3  ;;  %s753_s6 = scalar_lea.vmem %s157_s27, 128 }
  0x15   : > { %p754_p2 = scmp.ne.s32.totalorder %s157_s27, %s753_s6  ;;  %p761_p7 = scmp.lt.s32.totalorder %s157_s27, %s157_s27 }
  0x16   : > { %p744_p0 = pneg %p681_p13  ;;  %p762_p4 = scmp.lt.s32.totalorder %s753_s6, %s753_s6 }
  0x18   : > { %p756_p5 = pnand %p754_p2, %p744_p0  ;;  %p763_p11 = por %p762_p4, %p761_p7 }
  0x1a   : > { %p757_p6 = pneg %p756_p5 }
  0x1c   : > { %p764_p8 = pnand %p763_p11, %p757_p6 }
  0x1e   : > { %767 = shalt.err (!%p764_p8)
}
  0x1f   : > { %683 = dma.hbm_to_vmem [thread:$0]  (!%p681_p13), %s1153_s2, 128, %s157_s27, [#allocation6]  }
  0x20   : > { %s1029_s11 = scalar_lea.hbm %s1151_s0, %s655_s5  ;;  %s171_s12 = scalar_lea.vmem [#allocation2], %s635_s30 }
  0x21   : > { %s179_s13 = sshll.u32 %s171_s12, 4  ;;  %p1162_p1 = scmp.lt.s32.totalorder %s922_s18, 2  ;;  %s1031_s13 = int_to_ptr.vmem [resolvable:$true] %s179_s13 }
  0x22   : > { %s186_s15 = sand.u32 1, %s922_s18   ;;  %s638_s21 = sshll.u32 %s1017_s29, 5 }
  0x23   : > { %p1037_p4 = pnand %p1162_p1, %p1012_p12  ;;  %s168_s22 = scalar_lea.sflag [#allocation3], %s1017_s29 }
  0x24   : > { %s768_s26 = scalar_lea.hbm %s1029_s11, 128  ;;  %s773_s30 = scalar_lea.hbm %s1151_s0, 256 }
  0x25   : > { %p769_p7 = scmp.ne.s32.totalorder %s1029_s11, %s768_s26  ;;  %p770_p8 = pneg %p1037_p4 }
  0x26   : > { %p774_p11 = scmp.lt.s32.totalorder %s1029_s11, %s1151_s0  ;;  %p775_p12 = scmp.lt.s32.totalorder %s773_s30, %s768_s26 }
  0x27   : > { %p771_p9 = pnand %p770_p8, %p769_p7 }
  0x28   : > { %p776_p13 = por %p775_p12, %p774_p11 }
  0x29   : > { %p772_p10 = pneg %p771_p9 }
  0x2b   : > { %p777_p0 = pnand %p776_p13, %p772_p10 }
  0x2d   : > { %780 = shalt.err (!%p777_p0)
}
  0x2e   : > { %s781_s7 = scalar_lea.vmem %s1031_s13, 128  ;;  %s925_s8 = smov [#allocation2]  }
  0x2f   : > { %p782_p2 = scmp.ne.s32.totalorder %s1031_s13, %s781_s7  ;;  %s786_s9 = sshll.u32 %s925_s8, 4  ;;  %s787_s9 = int_to_ptr.vmem [resolvable:$false] %s786_s9 }
  0x30   : > { %s788_s10 = scalar_lea.vmem %s787_s9, 256  ;;  %p789_p1 = scmp.lt.s32.totalorder %s1031_s13, %s787_s9 }
  0x31   : > { %p784_p5 = pnand %p782_p2, %p770_p8  ;;  %p790_p7 = scmp.lt.s32.totalorder %s788_s10, %s781_s7 }
  0x33   : > { %p785_p6 = pneg %p784_p5  ;;  %p791_p9 = por %p790_p7, %p789_p1 }
  0x35   : > { %p792_p11 = pnand %p791_p9, %p785_p6 }
  0x37   : > { %795 = shalt.err (!%p792_p11)
}
  0x38   : > { %687 = dma.hbm_to_vmem [thread:$0]  (!%p1037_p4), %s1029_s11, 128, %s1031_s13, %s168_s22  }
  0x39   : > { %s656_s12 = sshll.u32 %s922_s18, 9  ;;  %s190_s30 = scalar_lea.vmem [#allocation5], %s638_s21 }
  0x3a   : > { %s1072_s28 = scalar_lea.hbm %s1152_s1, %s656_s12  ;;  %s198_s5 = sshll.u32 %s190_s30, 4  ;;  %s199_s5 = int_to_ptr.vmem [resolvable:$true] %s198_s5 }
  0x3b   : > { %s187_s6 = scalar_lea.sflag [#allocation6], %s186_s15  ;;  %s796_s7 = scalar_lea.hbm %s1072_s28, 512 }
  0x3c   : > { %p797_p10 = scmp.ne.s32.totalorder %s1072_s28, %s796_s7  ;;  %s801_s22 = scalar_lea.hbm %s1152_s1, 1024 }
  0x3d   : > { %p802_p0 = scmp.lt.s32.totalorder %s1072_s28, %s1152_s1  ;;  %p803_p2 = scmp.lt.s32.totalorder %s801_s22, %s796_s7 }
  0x3e   : > { %p799_p12 = pnand %p797_p10, %p770_p8 }
  0x3f   : > { %p804_p5 = por %p803_p2, %p802_p0 }
  0x40   : > { %p800_p13 = pneg %p799_p12 }
  0x42   : > { %p805_p6 = pnand %p804_p5, %p800_p13 }
  0x44   : > { %808 = shalt.err (!%p805_p6)
}
  0x45   : > { %s809_s18 = scalar_lea.vmem %s199_s5, 512  ;;  %s926_s15 = smov [#allocation5]  }
  0x46   : > { %p810_p1 = scmp.ne.s32.totalorder %s199_s5, %s809_s18  ;;  %s814_s21 = sshll.u32 %s926_s15, 4  ;;  %s815_s21 = int_to_ptr.vmem [resolvable:$false] %s814_s21 }
  0x47   : > { %s816_s9 = scalar_lea.vmem %s815_s21, 1024  ;;  %p817_p11 = scmp.lt.s32.totalorder %s199_s5, %s815_s21 }
  0x48   : > { %p812_p7 = pnand %p810_p1, %p770_p8  ;;  %p818_p10 = scmp.lt.s32.totalorder %s816_s9, %s809_s18 }
  0x4a   : > { %p813_p9 = pneg %p812_p7  ;;  %p819_p12 = por %p818_p10, %p817_p11 }
  0x4c   : > { %p820_p3 = pnand %p819_p12, %p813_p9 }
  0x4e   : > { %823 = shalt.err (!%p820_p3)
}
  0x4f   : > { %690 = dma.hbm_to_vmem [thread:$0]  (!%p1037_p4), %s1072_s28, 512, %s199_s5, %s187_s6  }
  0x50   : > { %p1164_p13 = scmp.ne.s32.totalorder %s1160_s25, 0 }
  0x51   : > { %s209_s10 = sand.u32 (!%p1164_p13), 1, %s914_s16   ;;  %p1165_p8 = scmp.ne.s32.totalorder (!%p1164_p13), %s1159_s24, 0 }
  0x52   : > { %207 = sbr.rel (%p1164_p13) target bundleno = 578 (0x242), region = 32  ;;  %s642_s12 = sshll.u32 (!%p1164_p13), %s209_s10, 3 }
  0x53   : > { %s210_s26 = scalar_lea.sflag (!%p1164_p13), [#allocation3], %s209_s10  ;;  %s213_s27 = scalar_lea.vmem (!%p1164_p13), [#allocation2], %s642_s12 }
  0x57   : > { %889 = dma.done.wait (%p1165_p8), %s210_s26, 128  }
  0x58   : > { %891 = vsyncadd (%p1165_p8), %s210_s26, 4294967168  ;;  %s218_s30 = sand.u32 1, %s977_s19   ;;  %s643_s14 = sshll.u32 %s209_s10, 5 }
  0x59   : > { %s219_s7 = scalar_lea.sflag [#allocation6], %s218_s30  ;;  %s222_s28 = scalar_lea.vmem [#allocation5], %s643_s14 }
  0x5a   : > { %893 = dma.done.wait (%p1165_p8), %s219_s7, 512  }
  0x5b   : > { %895 = vsyncadd (%p1165_p8), %s219_s7, 4294966784  ;;  %p1166_p3 = scmp.eq.s32.totalorder %s977_s19, 0 }
  0x5d   : > { %897 = dma.done.wait (%p1166_p3), [#allocation6], 128   ;;  %p1167_p4 = pmov %p1166_p3 }
  0x5e   : > { %p1168_p0 = scmp.ne.s32.totalorder %s977_s19, 0 }
  0x5f   : > { %899 = vsyncadd (%p1167_p4), [#allocation6], 4294967168 }
  0x60   : > { %256 = sbr.rel (%p1168_p0) target bundleno = 103 (0x67), region = 48 }
  0x65   : > { %vm257_vm0 = vcmask 58368   ;;  %v927_v0 = vmov 0.0  }
  0x66   : > { %258 = vst.msk [vmem:[#allocation8] sm:$0x3] %vm257_vm0, %v927_v0 }
  0x67 PF: > { %v262_v1 = vld [vmem:[%s222_s28 + $0x8] sm:$0xff]  ;;  %v264_v2 = vld [vmem:[%s222_s28 + $0x18] sm:$0xff]  ;;  %v261_v3 = vld [vmem:[%s222_s28] sm:$0xff]  ;;  %v270_v4 = vlaneseq  ;;  %v928_v7 = vmov 1983009808   ;;  %vm428_vm1 = vcmask 58368  }
  0x68   : > { %317 = vmatprep.subr.mxu0 %v262_v1  ;;  %387 = vmatprep.subr.mxu1 %v264_v2  ;;  %v263_v5 = vld [vmem:[%s222_s28 + $0x10] sm:$0xff]  ;;  %v268_v8 = vunpack.c.l.s4 %v928_v7  ;;  %p646_p2 = scmp.ne.s32.totalorder %s977_s19, 1 }
  0x69   : > { %v260_v6 = vld [vmem:[%s213_s27] sm:$0xff]  ;;  %318 = vmatpush1.xpose.msra.mxu0 %v261_v3  ;;  %388 = vmatpush1.xpose.msra.mxu1 %v263_v5  ;;  %v271_v9 = vshrl.u32 %v270_v4, 7 }
  0x6a   : > { %v269_v10 = vunpack.c.0.s8 %v268_v8  ;;  %v266_v11 = vcombine.high %v260_v6, %v260_v6 }
  0x6c   : > { %v272_v12 = vsub.s32 %v269_v10, %v271_v9 }
  0x6d   : > { %v259_v18 = vld [vmem:[#allocation8] sm:$0x3] }
  0x6e   : > { %v273_v13 = vrot.slane %v260_v6, %v272_v12  ;;  %v280_v14 = vrot.slane %v266_v11, %v272_v12 }
  0x70   : > { %v281_v15 = vcombine.high %v273_v13, %v273_v13  ;;  %v282_v16 = vcombine.high %v280_v14, %v280_v14 }
  0x72   : > { %351 = vmatprep.mubr.f32.mxu0 %v281_v15  ;;  %421 = vmatprep.mubr.f32.mxu1 %v282_v16 }
  0x73   : > { %352 = vmatmul.mubr.f32.vlgmr.msra.gmra.mxu0 %v273_v13  ;;  %422 = vmatmul.mubr.f32.vlgmr.msra.gmra.mxu1 %v280_v14 }
 0x133   : > { %v353_v17 = vpop.f32.mrf.mxu0  ;;  %v423_v19 = vpop.f32.mrf.mxu1 }
 0x134   : > { %v424_v20 = vadd.f32 %v423_v19, %v353_v17  ;;  %433 = sbr.rel (%p646_p2) target bundleno = 550 (0x226), region = 52 }
 0x135   : > { %v355_v21 = vpop.f32.mrf.mxu0  ;;  %v425_v22 = vpop.f32.mrf.mxu1 }
 0x136   : > { %v427_v23 = vadd.f32 %v424_v20, %v259_v18 }
 0x138   : > { %429 = vst.msk [vmem:[#allocation8] sm:$0x3] %vm428_vm1, %v427_v23 }
 0x139   : > { %v435_v24 = vld [vmem:[#allocation7] sm:$0xff]  ;;  %vm436_vm2 = vcmask 64512   ;;  %v929_v26 = vmov 0.0   ;;  %vm930_vm3 = vmmov 0   ;;  %vm518_vm4 = vcmask 254976  }
 0x13a   : > { %659 = vmatprep.subr.mxu0 %v929_v26  ;;  %661 = vmatprep.mubr.msk.f32.mxu0 %vm930_vm3, %v929_v26 }
 0x13b   : > { %660 = vmatpush3.msra.mxu0 %v435_v24 }
 0x13f   : > { %v434_v25 = vld [vmem:[#allocation8] sm:$0x3] }
 0x140   : > { %662 = vmatmul.mubr.msk.f32.vlgmr.msra.gmra.mxu0 %vm436_vm2, %v434_v25 }
 0x200   : > { %v506_v27 = vpop.f32.mrf.mxu0 }
 0x201   : > { %v648_v28 = vmul.f32 -1.442695, %v506_v27 }
 0x202   : > { %v663_v29 = vpop.f32.mrf.mxu0 }
 0x203   : > { %738 = vpow2.f32 %v648_v28 }
 0x210   : > { %v739_v30 = vpop.eup %738 }
 0x211   : > { %v513_v31 = vadd.f32 1.0, %v739_v30 }
 0x213   : > { %740 = vrcp.f32 %v513_v31 }
 0x220   : > { %v741_v32 = vpop.eup %740 }
 0x221   : > { %v516_v33 = vmul.f32 -0.016666668, %v741_v32 }
 0x223   : > { %v517_v34 = vadd.f32 0.033333335, %v516_v33 }
 0x225   : > { %519 = vst.msk [vmem:[#allocation9] sm:$0x3] %vm518_vm4, %v517_v34 }
 0x226 PF: > { %p694_p5 = scmp.eq.s32.totalorder %s977_s19, 1  ;;  %s931_s24 = smov [#allocation8]  }
 0x227   : > { %s527_s25 = sshll.u32 %s931_s24, 4  ;;  %s932_s5 = smov [#allocation9]   ;;  %s528_s25 = int_to_ptr.vmem [resolvable:$true] %s527_s25 }
 0x228   : > { %s538_s6 = sshll.u32 %s932_s5, 4  ;;  %s824_s11 = scalar_lea.vmem %s528_s25, 32  ;;  %s539_s6 = int_to_ptr.vmem [resolvable:$true] %s538_s6 }
 0x229   : > { %p825_p6 = scmp.ne.s32.totalorder %s528_s25, %s824_s11  ;;  %p831_p9 = scmp.lt.s32.totalorder %s528_s25, %s528_s25 }
 0x22a   : > { %p832_p11 = scmp.lt.s32.totalorder %s824_s11, %s824_s11 }
 0x22b   : > { %p826_p1 = pnand %p825_p6, %p694_p5 }
 0x22c   : > { %p833_p10 = por %p832_p11, %p831_p9 }
 0x22d   : > { %p827_p7 = pneg %p826_p1 }
 0x22f   : > { %p834_p12 = pnand %p833_p10, %p827_p7 }
 0x231   : > { %837 = shalt.err (!%p834_p12)
}
 0x232   : > { %673 = dma.vmem_to_hbm [thread:$0]  (%p694_p5), %s528_s25, 32, %s1154_s3, [#allocation4]  }
 0x233   : > { %s848_s8 = scalar_lea.vmem %s539_s6, 32  ;;  %p855_p4 = scmp.lt.s32.totalorder %s539_s6, %s539_s6 }
 0x234   : > { %p849_p13 = scmp.ne.s32.totalorder %s539_s6, %s848_s8  ;;  %p856_p0 = scmp.lt.s32.totalorder %s848_s8, %s848_s8 }
 0x236   : > { %p850_p8 = pnand %p849_p13, %p694_p5  ;;  %p857_p2 = por %p856_p0, %p855_p4 }
 0x238   : > { %p851_p3 = pneg %p850_p8 }
 0x23a   : > { %p858_p6 = pnand %p857_p2, %p851_p3 }
 0x23c   : > { %861 = shalt.err (!%p858_p6)
}
 0x23d   : > { %675 = dma.vmem_to_hbm [thread:$0]  (%p694_p5), %s539_s6, 32, %s1155_s4, [#allocation10]  }
 0x23e   : > { %901 = dma.done.wait (%p694_p5), [#allocation4], 32  }
 0x23f   : > { %903 = vsyncadd (%p694_p5), [#allocation4], 4294967264 }
 0x240   : > { %905 = dma.done.wait (%p694_p5), [#allocation10], 32  }
 0x241   : > { %907 = vsyncadd (%p694_p5), [#allocation10], 4294967264 }
 0x242 PF: > { %p20_p1 = scmp.ge.s32.totalorder %s980_s20, 4   ;;  %s1169_s15 = smov %s914_s16 }
 0x243   : > { %s1170_s16 = smov %s918_s17  ;;  %s1171_s17 = smov %s990_s23 }
 0x244   : > { %s1172_s18 = smov %s980_s20  ;;  %22 = sbr.rel (!%p20_p1) target bundleno = 7 (0x7), region = 102 }
 0x249   :  { %555 = vsyncpa [#allocation3], 1 }
 0x24a   :  { %557 = vsyncpa [#allocation3 + $0x1], 1 }
 0x24b   :  { %558 = vsyncpa [#allocation6], 1 }
 0x24c   :  { %560 = vsyncpa [#allocation6 + $0x1], 1 }
 0x24d   :  { %561 = vsyncpa [#allocation4], 1 }
 0x24e   :  { %563 = vsyncpa [#allocation4 + $0x1], 1 }
 0x24f   :  { %564 = vsyncpa [#allocation10], 1 }

</bundles_post_ra>
